<compile_context>
chip_gen: v5e
topology: v5e:2x2
jax: 0.10.0
libtpu: 0.0.40
codegen_flags: <defaults>
</compile_context>

<pallas_src>
import random

import jax
import jax.numpy as jnp
import numpy as np
from jax.experimental import pallas as pl
from jax.experimental.pallas import tpu as pltpu


# --------------------------- host-side filter weights ------------------------

def bilinear_aa_weights(in_size, out_size):
    """(out_size, in_size) matrix matching ATen upsample_bilinear2d_aa."""
    scale = in_size / out_size
    support = scale if scale >= 1.0 else 1.0
    invscale = (1.0 / scale) if scale >= 1.0 else 1.0
    w = np.zeros((out_size, in_size), dtype=np.float64)
    for i in range(out_size):
        center = scale * (i + 0.5)
        xmin = max(int(center - support + 0.5), 0)          # trunc like ATen
        xmax = min(int(center + support + 0.5), in_size)
        row = np.zeros((in_size,), dtype=np.float64)
        for x in range(xmin, xmax):
            row[x] = max(0.0, 1.0 - abs((x - center + 0.5) * invscale))
        total = row.sum()
        if total > 0.0:
            row /= total
        w[i] = row
    return w.astype(np.float32)


def nearest_indices(in_size, out_size):
    """Source indices matching interpolate(mode='nearest') legacy floor rule."""
    scale = in_size / out_size
    idx = np.floor(np.arange(out_size, dtype=np.float64) * scale).astype(np.int64)
    return np.minimum(idx, in_size - 1).astype(np.int32)


# ------------------------------ Pallas kernel --------------------------------

def make_resize_kernel(tk):
    def kernel(rw_ref, cwT_ref, x_ref, o_ref):
        h_out, h_in = rw_ref.shape
        w_in, w_out = cwT_ref.shape
        # Column pass: one fused MXU matmul over all tk planes.  The column
        # weights were pre-transposed host-side, so this is a native
        # (m, k) @ (k, n) matmul with no per-step transpose / XLU work.
        x2 = x_ref[...].astype(jnp.float32).reshape(tk * h_in, w_in)
        t = jnp.dot(x2, cwT_ref[...], preferred_element_type=jnp.float32)
        t = t.reshape(tk, h_in, w_out)
        # Row pass: a single batched dot_general (plane axis = batch dim).
        # The result lands directly in (tk, h_out, w_out) layout, so it can be
        # stored without any relayout; accumulation stays f32 in the MXU.
        rw_b = jnp.broadcast_to(rw_ref[...][None], (tk, h_out, h_in))
        out = jax.lax.dot_general(
            rw_b, t, (((2,), (1,)), ((0,), (0,))),
            preferred_element_type=jnp.float32)
        o_ref[...] = out.astype(o_ref.dtype)
    return kernel


def _vmem_capacity_bytes():
    try:
        return int(pltpu.get_tpu_info().vmem_capacity_bytes)
    except Exception:
        return 128 << 20   # v5e / v6e physical VMEM


def _choose_tile(k_total, per_plane_bytes, fixed_bytes, budget_bytes):
    # Keep grid >= 2 so v7x's two TensorCores both get work on the "parallel"
    # plane axis; pick the largest divisor of K that fits the VMEM budget
    # (divisor => no K padding and no output slice copy).
    cap = k_total // 2 if k_total >= 2 else 1
    best = 1
    for d in range(1, k_total + 1):
        if k_total % d == 0 and d <= cap and \
                fixed_bytes + d * per_plane_bytes <= budget_bytes:
            best = d
    return best


def resample_planes(x_planes, row_w, col_wT, out_dtype):
    """Separable resample of (K, H_in, W_in) planes: out = row_w @ x @ col_wT."""
    k_total, h_in, w_in = x_planes.shape
    h_out = row_w.shape[0]
    w_out = col_wT.shape[1]

    in_sz = np.dtype(x_planes.dtype).itemsize
    out_sz = np.dtype(out_dtype).itemsize

    # Complete per-grid-step VMEM accounting: double-buffered I/O blocks,
    # single-buffered resident weights, and the in-kernel f32 temporaries
    # (cast copy of x, intermediate t, broadcast row weights, f32 result).
    per_plane = (2 * h_in * w_in * in_sz + 2 * h_out * w_out * out_sz
                 + 4 * (h_in * w_in + h_in * w_out + h_out * h_in + h_out * w_out))
    fixed = 4 * (h_out * h_in + w_in * w_out)

    vmem_cap = _vmem_capacity_bytes()
    budget = min(24 << 20, vmem_cap // 4)          # ~24 MiB v5e/v6e, ~16 MiB v7x
    tk = _choose_tile(k_total, per_plane, fixed, budget)
    # TODO(synk): for 4K-class single planes that exceed the budget even at
    # tk=1, additionally tile the W_in contraction as an "arbitrary" grid axis.

    need = fixed + tk * per_plane
    vmem_limit = int(min(max(32 << 20, need + (4 << 20)), (3 * vmem_cap) // 4))

    flops = 2 * k_total * (h_in * w_in * w_out + h_out * h_in * w_out)
    bytes_accessed = (k_total * (h_in * w_in * in_sz + h_out * w_out * out_sz)
                      + 4 * (h_out * h_in + w_in * w_out))

    def weight_spec(shape):
        # Constant blocks: index never changes, so one buffer is enough.
        return pl.BlockSpec(shape, lambda t: (0, 0), pipeline_mode=pl.Buffered(1))

    return pl.pallas_call(
        make_resize_kernel(tk),
        out_shape=jax.ShapeDtypeStruct((k_total, h_out, w_out), out_dtype),
        grid_spec=pltpu.PrefetchScalarGridSpec(
            num_scalar_prefetch=0,
            grid=(k_total // tk,),
            in_specs=[
                weight_spec((h_out, h_in)),     # row weights (resident)
                weight_spec((w_in, w_out)),     # column weights, pre-transposed
                pl.BlockSpec((tk, h_in, w_in), lambda t: (t, 0, 0)),
            ],
            out_specs=pl.BlockSpec((tk, h_out, w_out), lambda t: (t, 0, 0)),
        ),
        compiler_params=pltpu.CompilerParams(
            dimension_semantics=("parallel",),     # planes split across TCs
            vmem_limit_bytes=vmem_limit),
        cost_estimate=pl.CostEstimate(flops=int(flops), transcendentals=0,
                                      bytes_accessed=int(bytes_accessed)),
    )(jnp.asarray(row_w), jnp.asarray(col_wT), x_planes)


# ------------------------------ forward wrapper ------------------------------

def get_random_size(h, w, min_size, max_size, random_seed=0):
    if min_size is None or max_size is None:
        raise ValueError('min_size and max_size must be provided')
    # TODO(synk): deterministic Python-RNG stand-in for torch.randint (not bit-exact torch RNG).
    rng = random.Random(random_seed)
    out_h = rng.randint(int(min_size * h), int(max_size * h))   # torch high-exclusive +1 -> inclusive
    out_w = rng.randint(int(min_size * w), int(max_size * w))
    return out_h, out_w


def resize_forward(image, mask, size=None, min_size=None, max_size=None, random_seed=0):
    b, c, h, w = image.shape
    bm, cm, hm, wm = mask.shape
    assert (hm, wm) == (h, w)

    if size is None:
        out_h, out_w = get_random_size(h, w, min_size, max_size, random_seed)
    else:
        out_h, out_w = int(size * h), int(size * w)

    # Antialiased bilinear for the image (Pallas kernel).  Weights are built
    # host-side in f32; column weights pre-transposed to (W_in, W_out).
    rw_img = bilinear_aa_weights(h, out_h)
    cw_imgT = np.ascontiguousarray(bilinear_aa_weights(w, out_w).T)
    img_out = resample_planes(image.reshape(b * c, h, w), rw_img, cw_imgT,
                              image.dtype)
    img_out = img_out.reshape(b, c, out_h, out_w)

    # Nearest for the mask: trivial index motion — per the perf review, two
    # jnp.take gathers beat a second one-hot-matmul pallas_call (and are exact
    # for integer-labelled masks).
    idx_h = jnp.asarray(nearest_indices(h, out_h))
    idx_w = jnp.asarray(nearest_indices(w, out_w))
    msk_out = jnp.take(jnp.take(mask, idx_h, axis=2), idx_w, axis=3)

    return img_out, msk_out


# ----------------------------------- main ------------------------------------

if __name__ == "__main__":
    key = jax.random.PRNGKey(0)
    B, C, H, W = 2, 4, 16, 16
    k1, k2 = jax.random.split(key)
    image = jax.random.uniform(k1, (B, C, H, W), dtype=jnp.float32)
    mask = (jax.random.uniform(k2, (B, 1, H, W)) > 0.5).astype(jnp.float32)

    # fixed-size path (size=0.5 -> 8x8)
    img_out, mask_out = resize_forward(image, mask, size=0.5)
    jax.block_until_ready((img_out, mask_out))

    out_h, out_w = int(0.5 * H), int(0.5 * W)
    rw = bilinear_aa_weights(H, out_h).astype(np.float64)
    cw = bilinear_aa_weights(W, out_w).astype(np.float64)
    ref_img = np.einsum('oh,bchw,pw->bcop', rw, np.asarray(image, np.float64), cw)
    np.testing.assert_allclose(np.asarray(img_out), ref_img, atol=1e-4, rtol=1e-4)

    ih, iw = nearest_indices(H, out_h), nearest_indices(W, out_w)
    ref_msk = np.asarray(mask)[:, :, ih][:, :, :, iw]
    np.testing.assert_allclose(np.asarray(mask_out), ref_msk, atol=0, rtol=0)

    # random-size path (exercises upscale), deterministic via seed
    img_out2, mask_out2 = resize_forward(
        image, mask, min_size=0.5, max_size=1.5, random_seed=0)
    jax.block_until_ready((img_out2, mask_out2))
    oh2, ow2 = img_out2.shape[-2:]
    rw2 = bilinear_aa_weights(H, oh2).astype(np.float64)
    cw2 = bilinear_aa_weights(W, ow2).astype(np.float64)
    ref_img2 = np.einsum('oh,bchw,pw->bcop', rw2, np.asarray(image, np.float64), cw2)
    np.testing.assert_allclose(np.asarray(img_out2), ref_img2, atol=1e-4, rtol=1e-4)

    ih2, iw2 = nearest_indices(H, oh2), nearest_indices(W, ow2)
    ref_msk2 = np.asarray(mask)[:, :, ih2][:, :, :, iw2]
    np.testing.assert_allclose(np.asarray(mask_out2), ref_msk2, atol=0, rtol=0)

    print("KERNEL_OK")
</pallas_src>

<mosaic_0001>
module attributes {stable_mosaic.version = 11 : i64} {
  func.func @kernel(%arg0: i32, %arg1: memref<8x16xf32, #tpu.memory_space<vmem>>, %arg2: memref<16x8xf32, #tpu.memory_space<vmem>>, %arg3: memref<4x16x16xf32, #tpu.memory_space<vmem>>, %arg4: memref<4x8x8xf32, #tpu.memory_space<vmem>>) attributes {dimension_semantics = [#tpu.dimension_semantics<parallel>], iteration_bounds = array<i64: 2>, scalar_prefetch = 0 : i64, scratch_operands = 0 : i64, tpu.core_type = #tpu.core_type<tc>, window_params = [{pipeline_mode = #tpu.pipeline_mode<synchronous>, transform_indices = @transform_0, window_bounds = array<i64: 8, 16>}, {pipeline_mode = #tpu.pipeline_mode<synchronous>, transform_indices = @transform_1, window_bounds = array<i64: 16, 8>}, {transform_indices = @transform_2, window_bounds = array<i64: 4, 16, 16>}, {transform_indices = @transform_3, window_bounds = array<i64: 4, 8, 8>}]} {
    %c0 = arith.constant 0 : index
    %c0_0 = arith.constant 0 : index
    %c0_1 = arith.constant 0 : index
    %0 = vector.load %arg3[%c0, %c0_0, %c0_1] : memref<4x16x16xf32, #tpu.memory_space<vmem>>, vector<4x16x16xf32>
    %1 = vector.shape_cast %0 : vector<4x16x16xf32> to vector<64x16xf32>
    %c0_2 = arith.constant 0 : index
    %c0_3 = arith.constant 0 : index
    %2 = vector.load %arg2[%c0_2, %c0_3] : memref<16x8xf32, #tpu.memory_space<vmem>>, vector<16x8xf32>
    %cst = arith.constant dense<0.000000e+00> : vector<64x8xf32>
    %3 = tpu.matmul %1, %2, %cst {dimension_numbers = #tpu.dot_dimension_numbers<[1], [0], [0], [1], [0, 0, 1, 1], [], []>} : vector<64x16xf32>, vector<16x8xf32>, vector<64x8xf32> -> vector<64x8xf32>
    %4 = vector.shape_cast %3 : vector<64x8xf32> to vector<4x16x8xf32>
    %c0_4 = arith.constant 0 : index
    %c0_5 = arith.constant 0 : index
    %5 = vector.load %arg1[%c0_4, %c0_5] : memref<8x16xf32, #tpu.memory_space<vmem>>, vector<8x16xf32>
    %6 = vector.shape_cast %5 : vector<8x16xf32> to vector<1x8x16xf32>
    %7 = vector.shape_cast %6 : vector<1x8x16xf32> to vector<1x8x16xf32>
    %8 = vector.broadcast %7 : vector<1x8x16xf32> to vector<4x8x16xf32>
    %cst_6 = arith.constant dense<0.000000e+00> : vector<4x8x8xf32>
    %9 = tpu.matmul %8, %4, %cst_6 {dimension_numbers = #tpu.dot_dimension_numbers<[2], [1], [1], [2], [0, 0, 0, 1, 1, 2], [0], [0]>} : vector<4x8x16xf32>, vector<4x16x8xf32>, vector<4x8x8xf32> -> vector<4x8x8xf32>
    %c0_7 = arith.constant 0 : index
    %c0_8 = arith.constant 0 : index
    %c0_9 = arith.constant 0 : index
    %10 = vector.load %arg4[%c0_7, %c0_8, %c0_9] : memref<4x8x8xf32, #tpu.memory_space<vmem>>, vector<4x8x8xf32>
    tpu.vector_store %arg4[%c0_7, %c0_8, %c0_9], %9 {strides = array<i32>} : memref<4x8x8xf32, #tpu.memory_space<vmem>>, vector<4x8x8xf32>,
    return
  }
  func.func @transform_0(%arg0: i32) -> (i32, i32) {
    %c0_i32 = arith.constant 0 : i32
    %c0_i32_0 = arith.constant 0 : i32
    %c0_i32_1 = arith.constant 0 : i32
    return %c0_i32, %c0_i32_0 : i32, i32
  }
  func.func @transform_1(%arg0: i32) -> (i32, i32) {
    %c0_i32 = arith.constant 0 : i32
    %c0_i32_0 = arith.constant 0 : i32
    %c0_i32_1 = arith.constant 0 : i32
    return %c0_i32, %c0_i32_0 : i32, i32
  }
  func.func @transform_2(%arg0: i32) -> (i32, i32, i32) {
    %c0_i32 = arith.constant 0 : i32
    %c0_i32_0 = arith.constant 0 : i32
    %c0_i32_1 = arith.constant 0 : i32
    return %arg0, %c0_i32, %c0_i32_0 : i32, i32, i32
  }
  func.func @transform_3(%arg0: i32) -> (i32, i32, i32) {
    %c0_i32 = arith.constant 0 : i32
    %c0_i32_0 = arith.constant 0 : i32
    %c0_i32_1 = arith.constant 0 : i32
    return %arg0, %c0_i32, %c0_i32_0 : i32, i32, i32
  }
}

</mosaic_0001>

<bundles_post_ra>
// kernel: tpu_custom_call.1
= control target key start
LH: loop header
LB: loop body
LE: loop exit
PB: predicated region body
PF: predicated region fallthrough
CT: control target
= control target key end

     0   :  { %8 = vsyncpa [#allocation3], 0  ;;  %s805_s0 = inlined_call_operand.vmem [shape: f32[8,16], index: 0, kind: input, shape index: {}]   ;;  %s806_s1 = inlined_call_operand.vmem [shape: f32[16,8], index: 1, kind: input, shape index: {}]   ;;  %s807_s2 = inlined_call_operand.hbm [shape: f32[8,16,16], index: 2, kind: input, shape index: {}]   ;;  %s808_s3 = inlined_call_operand.hbm [shape: f32[8,8,8], index: 3, kind: output, shape index: {}]  }
   0x1   :  { %10 = vsyncpa [#allocation3 + $0x1], 0 }
   0x2   :  { %11 = vsyncpa [#allocation4], 0 }
   0x3   :  { %13 = vsyncpa [#allocation4 + $0x1], 0  ;;  %s656_s12 = smov 0   ;;  %s658_s13 = smov 0  }
   0x4   :  { %s660_s14 = smov 0   ;;  %s662_s15 = smov 0  }
   0x5 LB: > { %s677_s16 = sadd.s32 4294967295, %s630_s15   ;;  %s448_s17 = sadd.s32 4294967294, %s630_s15   ;;  %s630_s15 = sphi %s662_s15, %s818_s15   ;;  %s626_s14 = sphi %s660_s14, %s817_s14   ;;  %s622_s13 = sphi %s658_s13, %s816_s13   ;;  %s618_s12 = sphi %s656_s12, %s815_s12  }
   0x6   : > { %s681_s18 = sadd.s32 1, %s630_s15   ;;  %s68_s19 = sadd.s32 1, %s626_s14 }
   0x7   : > { %s65_s20 = ssub.s32 %s630_s15, %s681_s18  ;;  %p75_p0 = scmp.ne.s32.totalorder %s626_s14, %s622_s13 }
   0x8   : > { %p66_p1 = scmp.eq.s32.totalorder %s65_s20, 0  ;;  %p76_p2 = scmp.eq.s32.totalorder %s630_s15, 0 }
   0x9   : > { %p81_p3 = scmp.ne.s32.totalorder %s622_s13, %s618_s12  ;;  %p82_p4 = scmp.eq.s32.totalorder %s677_s16, 0 }
   0xa   : > { %s693_s21 = scalar_select %p66_p1, %s626_s14, %s68_s19  }
   0xb   : > { %p695_p5 = por %p76_p2, %p75_p0  ;;  %p699_p6 = por %p82_p4, %p81_p3 }
   0xc   : > { %p105_p7 = scmp.eq.s32.totalorder %s677_s16, 1  ;;  %p111_p8 = scmp.eq.s32.totalorder %s448_s17, 1 }
   0xd   : > { %p496_p10 = scmp.lt.s32.totalorder %s630_s15, 2  ;;  %s137_s26 = sand.u32 1, %s626_s14  }
   0xe   : > { %p706_p11 = por %p105_p7, %p75_p0  ;;  %p710_p12 = por %p111_p8, %p81_p3 }
   0xf   : > { %s476_s27 = sshll.u32 %s630_s15, 6  ;;  %s451_s28 = sshll.u32 %s137_s26, 6 }
  0x10   : > { %s147_s4 = scalar_lea.hbm %s807_s2, %s476_s27  ;;  %s141_s6 = scalar_lea.vmem [#allocation2], %s451_s28 }
  0x11   : > { %s148_s5 = sshll.u32 %s147_s4, 4  ;;  %s150_s7 = sshll.u32 %s141_s6, 4  ;;  %s149_s5 = int_to_ptr.hbm [resolvable:$true] %s148_s5  ;;  %s151_s7 = int_to_ptr.vmem [resolvable:$true] %s150_s7 }
  0x12   : > { %p721_p13 = pnand %p496_p10, %p695_p5  ;;  %p455_p0 = scmp.ge.s32.totalorder %s630_s15, 1 }
  0x13   : > { %p158_p1 = scmp.lt.s32.totalorder %s630_s15, 3  ;;  %s138_s9 = scalar_lea.sflag [#allocation3], %s137_s26 }
  0x14   : > { %s534_s10 = sshra.s32 %s149_s5, 4  ;;  %p538_p3 = pneg %p721_p13  ;;  %s535_s10 = int_to_ptr.hbm [resolvable:$true] %s534_s10 }
  0x15   : > { %s536_s11 = scalar_lea.hbm %s535_s10, 64  ;;  %s541_s20 = scalar_lea.hbm %s807_s2, 128 }
  0x16   : > { %p537_p2 = scmp.ne.s32.totalorder %s535_s10, %s536_s11  ;;  %p542_p5 = scmp.lt.s32.totalorder %s535_s10, %s807_s2 }
  0x17   : > { %p543_p8 = scmp.lt.s32.totalorder %s541_s20, %s536_s11 }
  0x18   : > { %p539_p4 = pnand %p538_p3, %p537_p2 }
  0x19   : > { %p544_p10 = por %p543_p8, %p542_p5 }
  0x1a   : > { %p540_p7 = pneg %p539_p4 }
  0x1c   : > { %p545_p9 = pnand %p544_p10, %p540_p7 }
  0x1e   : > { %548 = shalt.err (!%p545_p9)
}
  0x1f   : > { %s632_s26 = smov 128   ;;  %s633_s28 = smov 8  }
  0x20   : > { %491 = dma.hbm_to_vmem [thread:$0]  (!%p721_p13), %s149_s5, 1024, %s151_s7, %s138_s9, %s632_s26, %s632_s26, %s633_s28  }
  0x21   : > { %p159_p2 = pnand %p455_p0, %p158_p1 }
  0x22   : > { %s742_s29 = sand.u32 (!%p159_p2), 1, %s622_s13  }
  0x23   : > { %162 = sbr.rel (%p159_p2) target bundleno = 325 (0x145), region = 32  ;;  %s456_s30 = sshll.u32 (!%p159_p2), %s742_s29, 6 }
  0x24   : > { %s165_s4 = scalar_lea.sflag (!%p159_p2), [#allocation3], %s742_s29  ;;  %s168_s6 = scalar_lea.vmem (!%p159_p2), [#allocation2], %s456_s30 }
  0x28   : > { %609 = dma.done.wait (%p699_p6), %s165_s4, 1024  }
  0x29   : > { %611 = vsyncadd (%p699_p6), %s165_s4, 4294966272  ;;  %v203_v0 = vld [vmem:[%s806_s1 + $0x8] sm:$0xff]  ;;  %v202_v1 = vld [vmem:[%s806_s1] sm:$0xff]  ;;  %vm204_vm0 = vcmask 130048   ;;  %s457_s11 = sshll.u32 %s742_s29, 5  ;;  %vm354_vm1 = vcmask 64512  }
  0x2a   : > { %243 = vmatpush.msra.mxu0 %v203_v0  ;;  %479 = vmatpush.msra.mxu2 %v203_v0  ;;  %v194_v2 = vld [vmem:[%s168_s6] sm:$0xff]  ;;  %v200_v4 = vld [vmem:[%s168_s6 + $0x30] sm:$0xff]  ;;  %v197_v5 = vld [vmem:[%s168_s6 + $0x18] sm:$0xff]  ;;  %s191_s17 = scalar_lea.vmem [#allocation5], %s457_s11  ;;  %s477_s19 = sshll.u32 %s677_s16, 5 }
  0x2b   : > { %v198_v3 = vld [vmem:[%s168_s6 + $0x20] sm:$0xff]  ;;  %480 = vmatpush.msra.mxu3 %v203_v0  ;;  %478 = vmatpush.msra.mxu1 %v203_v0  ;;  %v195_v6 = vld [vmem:[%s168_s6 + $0x8] sm:$0xff]  ;;  %v201_v8 = vld [vmem:[%s168_s6 + $0x38] sm:$0xff]  ;;  %s371_s27 = scalar_lea.hbm %s808_s3, %s477_s19  ;;  %s372_s26 = sshll.u32 %s191_s17, 4  ;;  %s373_s26 = int_to_ptr.vmem [resolvable:$true] %s372_s26 }
  0x2c   : > { %244 = vmatpush.msra.mxu0 %v202_v1  ;;  %482 = vmatpush.msra.mxu2 %v202_v1  ;;  %v199_v7 = vld [vmem:[%s168_s6 + $0x28] sm:$0xff]  ;;  %v196_v9 = vld [vmem:[%s168_s6 + $0x10] sm:$0xff]  ;;  %v270_v15 = vld [vmem:[%s805_s0] sm:$0xff]  ;;  %s374_s28 = sshll.u32 %s371_s27, 4  ;;  %s360_s30 = scalar_lea.sflag [#allocation4], %s742_s29  ;;  %s375_s28 = int_to_ptr.hbm [resolvable:$true] %s374_s28 }
  0x2d   : > { %458 = vmatmul.msk.f32.vlgmr.msra.gmra.mxu0 %vm204_vm0, %v194_v2  ;;  %462 = vmatmul.msk.f32.vlgmr.msra.gmra.mxu2 %vm204_vm0, %v198_v3  ;;  %s578_s4 = sshra.s32 %s375_s28, 4  ;;  %s584_s5 = scalar_lea.hbm %s808_s3, 64  ;;  %s579_s4 = int_to_ptr.hbm [resolvable:$true] %s578_s4 }
  0x2e   : > { %483 = vmatpush.msra.mxu3 %v202_v1  ;;  %481 = vmatpush.msra.mxu1 %v202_v1  ;;  %s580_s6 = scalar_lea.hbm %s579_s4, 32  ;;  %p585_p0 = scmp.lt.s32.totalorder %s579_s4, %s808_s3 }
  0x2f   : > { %464 = vmatmul.msk.f32.vlgmr.msra.gmra.mxu3 %vm204_vm0, %v200_v4  ;;  %461 = vmatmul.msk.f32.vlgmr.msra.gmra.mxu1 %vm204_vm0, %v197_v5  ;;  %p581_p6 = scmp.ne.s32.totalorder %s579_s4, %s580_s6  ;;  %p586_p1 = scmp.lt.s32.totalorder %s584_s5, %s580_s6 }
  0x31   : > { %p582_p9 = pnand %p581_p6, %p706_p11  ;;  %p587_p3 = por %p586_p1, %p585_p0 }
  0x33   : > { %p583_p13 = pneg %p582_p9 }
  0x35   : > { %459 = vmatmul.msk.f32.gmra.mxu0 %vm204_vm0, %v195_v6  ;;  %463 = vmatmul.msk.f32.gmra.mxu2 %vm204_vm0, %v199_v7  ;;  %p588_p4 = pnand %p587_p3, %p583_p13 }
  0x37   : > { %465 = vmatmul.msk.f32.gmra.mxu3 %vm204_vm0, %v201_v8 }
  0x3d   : > { %460 = vmatmul.msk.f32.gmra.mxu0 %vm204_vm0, %v196_v9 }
  0xaa   : > { %v246_v10 = vpop.f32.mrf.mxu0 }
  0xac   : > { %v255_v11 = vpop.f32.mrf.mxu1 }
  0xad   : > { %308 = vmatpush.msrb.mxu2 %v255_v11 }
  0xb0   : > { %v258_v12 = vpop.f32.mrf.mxu2 }
  0xb2   : > { %v249_v13 = vpop.f32.mrf.mxu0  ;;  %v264_v14 = vpop.f32.mrf.mxu3 }
  0xb3   : > { %288 = vmatpush.msrb.mxu1 %v249_v13 }
  0xb5   : > { %289 = vmatpush.msrb.mxu1 %v246_v10 }
  0xb6   : > { %466 = vmatmul.msk.f32.vlgmr.msrb.gmra.mxu1 %vm204_vm0, %v270_v15 }
  0xb8   : > { %v261_v16 = vpop.f32.mrf.mxu2 }
  0xb9   : > { %328 = vmatpush.msrb.mxu3 %v261_v16 }
  0xba   : > { %v267_v17 = vpop.f32.mrf.mxu3  ;;  %v252_v18 = vpop.f32.mrf.mxu0 }
  0xbb   : > { %329 = vmatpush.msrb.mxu3 %v258_v12  ;;  %348 = vmatpush.msra.mxu1 %v267_v17 }
  0xbc   : > { %309 = vmatpush.msrb.mxu2 %v252_v18  ;;  %468 = vmatmul.msk.f32.vlgmr.msrb.gmra.mxu3 %vm204_vm0, %v270_v15 }
  0xbd   : > { %349 = vmatpush.msra.mxu1 %v264_v14  ;;  %467 = vmatmul.msk.f32.vlgmr.msrb.gmra.mxu2 %vm204_vm0, %v270_v15 }
  0xbe   : > { %469 = vmatmul.msk.f32.vlgmr.msra.gmra.mxu1 %vm204_vm0, %v270_v15 }
 0x133   : > { %v291_v19 = vpop.f32.mrf.mxu1 }
 0x134   : > { %355 = vst.msk [vmem:[%s191_s17] sm:$0xff] %vm354_vm1, %v291_v19 }
 0x13b   : > { %v351_v20 = vpop.f32.mrf.mxu1 }
 0x13c   : > { %358 = vst.msk [vmem:[%s191_s17 + $0x18] sm:$0xff] %vm354_vm1, %v351_v20 }
 0x13f   : > { %v331_v21 = vpop.f32.mrf.mxu3 }
 0x140   : > { %v311_v22 = vpop.f32.mrf.mxu2  ;;  %357 = vst.msk [vmem:[%s191_s17 + $0x10] sm:$0xff] %vm354_vm1, %v331_v21 }
 0x141   : > { %356 = vst.msk [vmem:[%s191_s17 + $0x8] sm:$0xff] %vm354_vm1, %v311_v22 }
 0x142   : > { %591 = shalt.err (!%p588_p4)
}
 0x143   : > { %s634_s29 = smov 128   ;;  %s635_s23 = smov 8  }
 0x144   : > { %486 = dma.vmem_to_hbm [thread:$0]  (%p706_p11), %s373_s26, 512, %s375_s28, %s360_s30, %s634_s29, %s634_s29, %s635_s23  }
 0x145 PF: > { %s389_s10 = sand.u32 1, %s618_s12   ;;  %p814_p7 = scmp.ge.s32.totalorder %s630_s15, 2 }
 0x146   : > { %s390_s11 = scalar_lea.sflag [#allocation4], %s389_s10 }
 0x147   : > { %p493_p5 = pnand %p814_p7, %p710_p12 }
 0x149   : > { %p494_p8 = pneg %p493_p5 }
 0x14b   : > { %613 = dma.done.wait (%p494_p8), %s390_s11, 512  }
 0x14c   : > { %615 = vsyncadd (%p494_p8), %s390_s11, 4294966784  ;;  %p16_p10 = scmp.ge.s32.totalorder %s681_s18, 4   ;;  %s815_s12 = smov %s622_s13 }
 0x14d   : > { %s816_s13 = smov %s626_s14  ;;  %s817_s14 = smov %s693_s21 }
 0x14e   : > { %s818_s15 = smov %s681_s18  ;;  %18 = sbr.rel (!%p16_p10) target bundleno = 5 (0x5), region = 77 }
 0x153   :  { %396 = vsyncpa [#allocation3], 1 }
 0x154   :  { %398 = vsyncpa [#allocation3 + $0x1], 1 }
 0x155   :  { %399 = vsyncpa [#allocation4], 1 }
 0x156   :  { %401 = vsyncpa [#allocation4 + $0x1], 1 }

</bundles_post_ra>
